<compile_context>
chip_gen: v5e
topology: v5e:2x2
jax: 0.10.0
libtpu: 0.0.40
codegen_flags: <defaults>
</compile_context>

<pallas_src>
import functools

import jax
import jax.numpy as jnp
from jax import lax
from jax.experimental import pallas as pl
from jax.experimental.pallas import tpu as pltpu

GAMMA = 1.5
ALPHA = 0.25
LANES = 128


def _num_tensorcores() -> int:
    """TensorCores per chip: 2 on v7x, else 1 (conservative heuristic)."""
    # TODO(synk): switch to pltpu.get_tpu_info() once a stable per-chip core-count field exists.
    try:
        kind = jax.devices()[0].device_kind.lower()
    except Exception:
        return 1
    return 2 if ("v7" in kind or "7x" in kind) else 1


def _focal_kernel(pred_ref, true_ref, out_ref, acc_ref, *, gamma, alpha,
                  tiles_per_shard, n_tiles, last_count, tile_elems,
                  has_pad, has_dup):
    s = pl.program_id(0)
    i = pl.program_id(1)

    @pl.when(i == 0)
    def _():
        acc_ref[...] = jnp.zeros_like(acc_ref)

    x = pred_ref[...].astype(jnp.float32)
    t = true_ref[...].astype(jnp.float32)

    # One shared exp(-|x|) drives both the numerically-stable BCE and the sigmoid
    # (saves one EUP exp and the sigmoid divide).
    e = jnp.exp(-jnp.abs(x))
    bce = jnp.maximum(x, 0.0) - x * t + jnp.log1p(e)      # BCEWithLogits, reduction='none'
    r = pl.reciprocal(1.0 + e, approx=True)               # EUP vrcp
    p = jnp.where(x >= 0.0, r, e * r)                     # == sigmoid(x)

    # Folded focal factors:
    #   alpha_factor = t*a + (1-t)*(1-a) = (1-a) + t*(2a-1)
    #   d = 1 - p_t  = t + p - 2*t*p   (clamped: f32 rounding with soft targets)
    alpha_factor = (1.0 - alpha) + t * (2.0 * alpha - 1.0)
    d = jnp.maximum(t + p - 2.0 * (t * p), 0.0)
    if float(gamma) == 1.5:
        mod = d * jnp.sqrt(d)                             # gamma=1.5 fast path (no pow)
    else:
        mod = d ** gamma
    loss = bce * alpha_factor * mod

    if not (has_pad or has_dup):
        # Fully aligned case: no masking anywhere.
        acc_ref[...] += loss.sum(axis=0, keepdims=True)
    else:
        tile_idx = s * tiles_per_shard + i
        last = n_tiles - 1

        @pl.when(tile_idx < last)
        def _():
            # Steady state: full tile, no mask cost.
            acc_ref[...] += loss.sum(axis=0, keepdims=True)

        @pl.when(tile_idx == last)
        def _():
            # Only the last valid tile pays the mask (pad + clipped overhang).
            l = loss
            if has_pad:
                row = lax.broadcasted_iota(jnp.int32, loss.shape, 0)
                lane = lax.broadcasted_iota(jnp.int32, loss.shape, 1)
                # Local index vs per-tile residual count: no int32 overflow for any n.
                l = jnp.where(row * LANES + lane < last_count, l, 0.0)
            acc_ref[...] += l.sum(axis=0, keepdims=True)
        # tile_idx > last (clamped duplicate tail blocks): skip accumulation entirely.

    @pl.when(i == pl.num_programs(1) - 1)
    def _():
        out_ref[...] = acc_ref[...]


def focal_loss(pred, true, *, gamma=GAMMA, alpha=ALPHA, reduction="mean",
               max_tile_rows=None, n_shards=None):
    """Focal loss matching the PyTorch module (BCEWithLogitsLoss base, mean/sum reduction)."""
    assert pred.shape == true.shape
    n = pred.size
    assert n > 0
    # TODO(synk): reduction='none' (full elementwise output) not implemented; the default
    # nn.BCEWithLogitsLoss() has reduction='mean', which is what this module returns.
    assert reduction in ("mean", "sum")

    ncores = _num_tensorcores()
    if max_tile_rows is None:
        # 2 MiB f32 blocks everywhere; 4 MiB on 2-TC (higher-BW) chips. Double-buffered
        # footprint stays well inside the explicit 32 MiB vmem limit on every generation.
        max_tile_rows = 8192 if ncores >= 2 else 4096

    def prep(a):
        a = jnp.ravel(a)                       # keep caller dtype (cast to f32 in VMEM)
        padd = (-a.size) % LANES
        if padd:
            a = jnp.pad(a, (0, padd))          # tiny pad to a lane multiple
        return a.reshape(-1, LANES)

    pred2 = prep(pred)
    true2 = prep(true)
    rows = pred2.shape[0]

    tile_rows = rows if rows <= max_tile_rows else max_tile_rows
    n_tiles = pl.cdiv(rows, tile_rows)

    if n_shards is None:
        n_shards = ncores if n_tiles >= ncores else 1

    def build_and_run(shards):
        tiles_per_shard = pl.cdiv(n_tiles, shards)
        tile_elems = tile_rows * LANES
        last_count = n - (n_tiles - 1) * tile_elems       # valid elems in the last tile
        has_pad = last_count != tile_elems
        has_dup = shards * tiles_per_shard != n_tiles

        kernel = functools.partial(
            _focal_kernel, gamma=gamma, alpha=alpha,
            tiles_per_shard=tiles_per_shard, n_tiles=n_tiles,
            last_count=last_count, tile_elems=tile_elems,
            has_pad=has_pad, has_dup=has_dup)

        def in_map(s, i):
            # Clamp duplicated tail steps onto the last valid block (skipped in-kernel).
            return (jnp.minimum(s * tiles_per_shard + i, n_tiles - 1), 0)

        if shards > 1:
            # v7x: actually split the shard axis across the two TensorCores.
            dim_sem = (pltpu.CORE_PARALLEL, pltpu.ARBITRARY)
        else:
            dim_sem = ("arbitrary", "arbitrary")

        bytes_in = n * (jnp.dtype(pred.dtype).itemsize + jnp.dtype(true.dtype).itemsize)
        cost = pl.CostEstimate(
            flops=16 * n,
            transcendentals=4 * n,
            bytes_accessed=bytes_in + shards * LANES * 4,
        )

        return pl.pallas_call(
            kernel,
            out_shape=jax.ShapeDtypeStruct((shards, LANES), jnp.float32),
            grid_spec=pltpu.PrefetchScalarGridSpec(
                num_scalar_prefetch=0,
                grid=(shards, tiles_per_shard),
                in_specs=[
                    pl.BlockSpec((tile_rows, LANES), in_map),
                    pl.BlockSpec((tile_rows, LANES), in_map),
                ],
                out_specs=pl.BlockSpec((1, LANES), lambda s, i: (s, 0)),
                scratch_shapes=[pltpu.VMEM((1, LANES), jnp.float32)],
            ),
            compiler_params=pltpu.CompilerParams(
                dimension_semantics=dim_sem,
                vmem_limit_bytes=32 * 1024 * 1024,
            ),
            cost_estimate=cost,
        )(pred2, true2)

    try:
        out = build_and_run(n_shards)
    except Exception:
        if n_shards == 1:
            raise
        out = build_and_run(1)     # safe fallback if core-parallel lowering is unavailable

    total = jnp.sum(out)
    if reduction == "mean":
        return total * (1.0 / float(n))
    return total


def focal_loss_ref(pred, true, *, gamma=GAMMA, alpha=ALPHA):
    """Pure-JAX reference mirroring the PyTorch FocalLoss module (mean reduction)."""
    x = pred.astype(jnp.float32)
    t = true.astype(jnp.float32)
    bce = jnp.maximum(x, 0.0) - x * t + jnp.log1p(jnp.exp(-jnp.abs(x)))
    p = jax.nn.sigmoid(x)
    p_t = t * p + (1.0 - t) * (1.0 - p)
    loss = bce * (t * alpha + (1.0 - t) * (1.0 - alpha)) * (1.0 - p_t) ** gamma
    return jnp.mean(loss)


if __name__ == "__main__":
    key = jax.random.PRNGKey(0)
    k1, k2, k3, k4 = jax.random.split(key, 4)

    # Tolerance accounts for the EUP approximate-reciprocal sigmoid (~1e-4 rel / element).
    RTOL, ATOL = 1e-3, 1e-6

    # NCHW-shaped logits/targets, lane-aligned case (single tile, no masking).
    pred = jax.random.normal(k1, (2, 4, 16, 16), dtype=jnp.float32)
    true = (jax.random.uniform(k2, (2, 4, 16, 16)) > 0.5).astype(jnp.float32)
    out = jax.block_until_ready(focal_loss(pred, true))
    ref = focal_loss_ref(pred, true)
    assert jnp.allclose(out, ref, rtol=RTOL, atol=ATOL), (out, ref)

    # Ragged (non-multiple-of-128) case: in-kernel tail mask on the last tile only.
    pred_r = jax.random.normal(k3, (3, 5, 7, 11), dtype=jnp.float32)
    true_r = (jax.random.uniform(k4, (3, 5, 7, 11)) > 0.5).astype(jnp.float32)
    out_r = jax.block_until_ready(focal_loss(pred_r, true_r))
    ref_r = focal_loss_ref(pred_r, true_r)
    assert jnp.allclose(out_r, ref_r, rtol=RTOL, atol=ATOL), (out_r, ref_r)

    # Multi-tile paths (small data, tiny forced tile): aligned and ragged.
    out_m = jax.block_until_ready(focal_loss(pred, true, max_tile_rows=8))
    assert jnp.allclose(out_m, ref, rtol=RTOL, atol=ATOL), (out_m, ref)
    out_mr = jax.block_until_ready(focal_loss(pred_r, true_r, max_tile_rows=8))
    assert jnp.allclose(out_mr, ref_r, rtol=RTOL, atol=ATOL), (out_mr, ref_r)

    print("KERNEL_OK")
</pallas_src>

<mosaic_0001>
module attributes {stable_mosaic.version = 11 : i64} {
  func.func @_focal_kernel(%arg0: i32, %arg1: i32, %arg2: memref<16x128xf32, #tpu.memory_space<vmem>>, %arg3: memref<16x128xf32, #tpu.memory_space<vmem>>, %arg4: memref<1x128xf32, #tpu.memory_space<vmem>>, %arg5: memref<1x128xf32, #tpu.memory_space<vmem>>) attributes {dimension_semantics = [#tpu.dimension_semantics<arbitrary>, #tpu.dimension_semantics<arbitrary>], iteration_bounds = array<i64: 1, 1>, scalar_prefetch = 0 : i64, scratch_operands = 1 : i64, tpu.core_type = #tpu.core_type<tc>, window_params = [{transform_indices = @transform_0, window_bounds = array<i64: 16, 128>}, {transform_indices = @transform_1, window_bounds = array<i64: 16, 128>}, {transform_indices = @transform_2, window_bounds = array<i64: 1, 128>}]} {
    %c0_i32 = arith.constant 0 : i32
    %0 = arith.cmpi eq, %arg1, %c0_i32 : i32
    %1 = arith.extui %0 : i1 to i32
    %c0_i32_0 = arith.constant 0 : i32
    %2 = arith.cmpi ne, %1, %c0_i32_0 : i32
    scf.if %2 {
      %cst_18 = arith.constant 0.000000e+00 : f32
      %45 = vector.broadcast %cst_18 : f32 to vector<1x128xf32>
      %c0_19 = arith.constant 0 : index
      %c0_20 = arith.constant 0 : index
      %46 = vector.load %arg5[%c0_19, %c0_20] : memref<1x128xf32, #tpu.memory_space<vmem>>, vector<1x128xf32>
      tpu.vector_store %arg5[%c0_19, %c0_20], %45 {strides = array<i32>} : memref<1x128xf32, #tpu.memory_space<vmem>>, vector<1x128xf32>,
    } else {
    }
    %c0 = arith.constant 0 : index
    %c0_1 = arith.constant 0 : index
    %3 = vector.load %arg2[%c0, %c0_1] : memref<16x128xf32, #tpu.memory_space<vmem>>, vector<16x128xf32>
    %c0_2 = arith.constant 0 : index
    %c0_3 = arith.constant 0 : index
    %4 = vector.load %arg3[%c0_2, %c0_3] : memref<16x128xf32, #tpu.memory_space<vmem>>, vector<16x128xf32>
    %5 = math.absf %3 : vector<16x128xf32>
    %cst = arith.constant 0.000000e+00 : f32
    %6 = vector.broadcast %cst : f32 to vector<16x128xf32>
    %7 = arith.subf %6, %5 : vector<16x128xf32>
    %8 = math.exp %7 : vector<16x128xf32>
    %cst_4 = arith.constant 0.000000e+00 : f32
    %9 = vector.broadcast %cst_4 : f32 to vector<16x128xf32>
    %10 = arith.maximumf %3, %9 : vector<16x128xf32>
    %11 = arith.mulf %3, %4 : vector<16x128xf32>
    %12 = arith.subf %10, %11 : vector<16x128xf32>
    %13 = math.log1p %8 : vector<16x128xf32>
    %14 = arith.addf %12, %13 : vector<16x128xf32>
    %cst_5 = arith.constant 1.000000e+00 : f32
    %15 = vector.broadcast %cst_5 : f32 to vector<16x128xf32>
    %16 = arith.addf %15, %8 : vector<16x128xf32>
    %17 = tpu.reciprocal %16 {approx = true} : vector<16x128xf32> -> vector<16x128xf32>
    %cst_6 = arith.constant 0.000000e+00 : f32
    %18 = vector.broadcast %cst_6 : f32 to vector<16x128xf32>
    %19 = arith.cmpf oge, %3, %18 : vector<16x128xf32>
    %20 = arith.mulf %8, %17 : vector<16x128xf32>
    %21 = arith.select %19, %17, %20 : vector<16x128xi1>, vector<16x128xf32>
    %cst_7 = arith.constant -5.000000e-01 : f32
    %22 = vector.broadcast %cst_7 : f32 to vector<16x128xf32>
    %23 = arith.mulf %4, %22 : vector<16x128xf32>
    %cst_8 = arith.constant 7.500000e-01 : f32
    %24 = vector.broadcast %cst_8 : f32 to vector<16x128xf32>
    %25 = arith.addf %24, %23 : vector<16x128xf32>
    %26 = arith.addf %4, %21 : vector<16x128xf32>
    %27 = arith.mulf %4, %21 : vector<16x128xf32>
    %cst_9 = arith.constant 2.000000e+00 : f32
    %28 = vector.broadcast %cst_9 : f32 to vector<16x128xf32>
    %29 = arith.mulf %28, %27 : vector<16x128xf32>
    %30 = arith.subf %26, %29 : vector<16x128xf32>
    %cst_10 = arith.constant 0.000000e+00 : f32
    %31 = vector.broadcast %cst_10 : f32 to vector<16x128xf32>
    %32 = arith.maximumf %30, %31 : vector<16x128xf32>
    %33 = math.sqrt %32 : vector<16x128xf32>
    %34 = arith.mulf %32, %33 : vector<16x128xf32>
    %35 = arith.mulf %14, %25 : vector<16x128xf32>
    %36 = arith.mulf %35, %34 : vector<16x128xf32>
    %c0_11 = arith.constant 0 : index
    %c0_12 = arith.constant 0 : index
    %37 = vector.load %arg5[%c0_11, %c0_12] : memref<1x128xf32, #tpu.memory_space<vmem>>, vector<1x128xf32>
    %cst_13 = arith.constant dense<0.000000e+00> : vector<128xf32>
    %38 = vector.multi_reduction <add>, %36, %cst_13 [0] : vector<16x128xf32> to vector<128xf32>
    %39 = vector.shape_cast %38 : vector<128xf32> to vector<1x128xf32>
    %40 = arith.addf %37, %39 : vector<1x128xf32>
    %c0_14 = arith.constant 0 : index
    %c0_15 = arith.constant 0 : index
    %41 = vector.load %arg5[%c0_14, %c0_15] : memref<1x128xf32, #tpu.memory_space<vmem>>, vector<1x128xf32>
    tpu.vector_store %arg5[%c0_14, %c0_15], %40 {strides = array<i32>} : memref<1x128xf32, #tpu.memory_space<vmem>>, vector<1x128xf32>,
    %c0_i32_16 = arith.constant 0 : i32
    %42 = arith.cmpi eq, %arg1, %c0_i32_16 : i32
    %43 = arith.extui %42 : i1 to i32
    %c0_i32_17 = arith.constant 0 : i32
    %44 = arith.cmpi ne, %43, %c0_i32_17 : i32
    scf.if %44 {
      %c0_18 = arith.constant 0 : index
      %c0_19 = arith.constant 0 : index
      %45 = vector.load %arg5[%c0_18, %c0_19] : memref<1x128xf32, #tpu.memory_space<vmem>>, vector<1x128xf32>
      %c0_20 = arith.constant 0 : index
      %c0_21 = arith.constant 0 : index
      %46 = vector.load %arg4[%c0_20, %c0_21] : memref<1x128xf32, #tpu.memory_space<vmem>>, vector<1x128xf32>
      tpu.vector_store %arg4[%c0_20, %c0_21], %45 {strides = array<i32>} : memref<1x128xf32, #tpu.memory_space<vmem>>, vector<1x128xf32>,
    } else {
    }
    return
  }
  func.func @transform_0(%arg0: i32, %arg1: i32) -> (i32, i32) {
    %c1_i32 = arith.constant 1 : i32
    %0 = arith.muli %arg0, %c1_i32 : i32
    %1 = arith.addi %0, %arg1 : i32
    %c0_i32 = arith.constant 0 : i32
    %2 = arith.minsi %1, %c0_i32 : i32
    %c0_i32_0 = arith.constant 0 : i32
    %c0_i32_1 = arith.constant 0 : i32
    return %2, %c0_i32_0 : i32, i32
  }
  func.func @transform_1(%arg0: i32, %arg1: i32) -> (i32, i32) {
    %c1_i32 = arith.constant 1 : i32
    %0 = arith.muli %arg0, %c1_i32 : i32
    %1 = arith.addi %0, %arg1 : i32
    %c0_i32 = arith.constant 0 : i32
    %2 = arith.minsi %1, %c0_i32 : i32
    %c0_i32_0 = arith.constant 0 : i32
    %c0_i32_1 = arith.constant 0 : i32
    return %2, %c0_i32_0 : i32, i32
  }
  func.func @transform_2(%arg0: i32, %arg1: i32) -> (i32, i32) {
    %c0_i32 = arith.constant 0 : i32
    %c0_i32_0 = arith.constant 0 : i32
    return %arg0, %c0_i32 : i32, i32
  }
}

</mosaic_0001>

<bundles_post_ra>
// kernel: tpu_custom_call.1
= control target key start
LH: loop header
LB: loop body
LE: loop exit
PB: predicated region body
PF: predicated region fallthrough
CT: control target
= control target key end

     0   :  { %7 = vsyncpa [#allocation4], 0  ;;  %s352_s0 = inlined_call_operand.hbm [shape: f32[16,128], index: 0, kind: input, shape index: {}]   ;;  %s353_s1 = inlined_call_operand.hbm [shape: f32[16,128], index: 1, kind: input, shape index: {}]   ;;  %s354_s2 = inlined_call_operand.hbm [shape: f32[1,128], index: 2, kind: output, shape index: {}]  }
   0x1   :  { %8 = vsyncpa [#allocation7], 0 }
   0x2   :  { %9 = vsyncpa [#allocation5], 0  ;;  %s20_s11 = sshll.u32 %s352_s0, 4  ;;  %s298_s12 = smov [#allocation3]   ;;  %s21_s11 = int_to_ptr.hbm [resolvable:$true] %s20_s11 }
   0x3   :  { %s22_s13 = sshll.u32 %s298_s12, 4  ;;  %s39_s16 = sshll.u32 %s353_s1, 4  ;;  %s23_s13 = int_to_ptr.vmem [resolvable:$true] %s22_s13  ;;  %s40_s16 = int_to_ptr.hbm [resolvable:$true] %s39_s16 }
   0x4   :  { %s299_s17 = smov 128   ;;  %s300_s18 = smov 8  }
   0x5   :  { %28 = dma.hbm_to_vmem [thread:$0]  %s21_s11, 256, %s23_s13, [#allocation4], %s299_s17, %s299_s17, %s300_s18  }
   0x6   :  { %s301_s19 = smov [#allocation6]  }
   0x7   :  { %s41_s20 = sshll.u32 %s301_s19, 4  ;;  %s42_s20 = int_to_ptr.vmem [resolvable:$true] %s41_s20 }
   0x8   :  { %47 = dma.hbm_to_vmem [thread:$0]  %s40_s16, 256, %s42_s20, [#allocation7], %s299_s17, %s299_s17, %s300_s18  }
   0x9   :  { %292 = dma.done.wait [#allocation4], 256  }
   0xa   :  { %293 = vsyncadd [#allocation4], 4294967040 }
   0xb   :  { %294 = dma.done.wait [#allocation7], 256  }
   0xc   :  { %295 = vsyncadd [#allocation7], 4294967040  ;;  %v302_v0 = vmov 0.0   ;;  %v325_v1 = vld [vmem:[#allocation3] sm:$0xff]  ;;  %v327_v2 = vld [vmem:[#allocation3 + $0x8] sm:$0xff]  ;;  %s303_s0 = smov [#allocation8]  }
   0xd   :  { %68 = vst [vmem:[#allocation2] sm:$0x1] %v302_v0  ;;  %v73_v3 = vand.u32 2147483647, %v325_v1  ;;  %v74_v4 = vand.u32 2147483647, %v327_v2 }
   0xe   :  { %vm111_vm0 = vcmp.ge.f32.partialorder %v325_v1, 0.0  ;;  %v71_v15 = vld [vmem:[#allocation6] sm:$0xff]  ;;  %vm112_vm1 = vcmp.ge.f32.partialorder %v327_v2, 0.0  ;;  %v72_v17 = vld [vmem:[#allocation6 + $0x8] sm:$0xff]  ;;  %v81_v41 = vmax.f32 %v325_v1, 0.0  ;;  %v82_v42 = vmax.f32 %v327_v2, 0.0 }
   0xf   :  { %v75_v5 = vsub.f32 0.0, %v73_v3  ;;  %v76_v6 = vsub.f32 0.0, %v74_v4  ;;  %v83_v43 = vmul.f32 %v71_v15, %v325_v1  ;;  %v84_v45 = vmul.f32 %v72_v17, %v327_v2  ;;  %s181_s1 = sshll.u32 %s303_s0, 4  ;;  %s183_s23 = sshll.u32 %s354_s2, 4  ;;  %s182_s1 = int_to_ptr.vmem [resolvable:$true] %s181_s1  ;;  %s184_s23 = int_to_ptr.hbm [resolvable:$true] %s183_s23 }
  0x10   :  { %v117_v56 = vmul.f32 -0.5, %v71_v15  ;;  %v118_v57 = vmul.f32 -0.5, %v72_v17 }
  0x11   :  { %v77_v7 = vmul.f32 1.442695, %v75_v5  ;;  %v79_v8 = vmul.f32 1.442695, %v76_v6  ;;  %v85_v55 = vsub.f32 %v81_v41, %v83_v43  ;;  %v86_v59 = vsub.f32 %v82_v42, %v84_v45 }
  0x12   :  { %v119_v2 = vadd.f32 0.75, %v117_v56  ;;  %v120_v3 = vadd.f32 0.75, %v118_v57 }
  0x13   :  { %204 = vpow2.f32 %v77_v7 }
  0x14   :  { %206 = vpow2.f32 %v79_v8 }
  0x19   :  { %v205_v9 = vpop.eup %204 }
  0x1a   :  { %v207_v10 = vpop.eup %206  ;;  %v87_v11 = vadd.f32 1.0, %v205_v9  ;;  %v90_v31 = vmul.f32 -0.5, %v205_v9  ;;  %v93_v36 = vand.u32 2147483647, %v205_v9 }
  0x1b   :  { %v96_v12 = vadd.f32 1.0, %v207_v10  ;;  %v99_v32 = vmul.f32 -0.5, %v207_v10  ;;  %v102_v39 = vand.u32 2147483647, %v207_v10 }
  0x1c   :  { %208 = vrcp.f32 %v87_v11  ;;  %v91_v34 = vadd.f32 1.0, %v90_v31  ;;  %vm337_vm2 = vcmp.lt.f32.partialorder %v93_v36, 0.0004427343 }
  0x1d   :  { %210 = vrcp.f32 %v96_v12  ;;  %v100_v37 = vadd.f32 1.0, %v99_v32  ;;  %vm341_vm3 = vcmp.lt.f32.partialorder %v102_v39, 0.0004427343 }
  0x1e   :  { %212 = vlog2.f32 %v87_v11  ;;  %v92_v47 = vmul.f32 %v205_v9, %v91_v34 }
  0x1f   :  { %214 = vlog2.f32 %v96_v12  ;;  %v101_v51 = vmul.f32 %v207_v10, %v100_v37 }
  0x22   :  { %v209_v13 = vpop.eup %208 }
  0x23   :  { %v211_v14 = vpop.eup %210  ;;  %v113_v16 = vmul.f32 %v209_v13, %v205_v9 }
  0x24   :  { %v114_v18 = vmul.f32 %v211_v14, %v207_v10  ;;  %v213_v33 = vpop.eup %212 }
  0x25   :  { %v115_v19 = vsel %vm111_vm0, %v209_v13, %v113_v16  ;;  %v215_v35 = vpop.eup %214  ;;  %v89_v46 = vmul.f32 0.6931472, %v213_v33 }
  0x26   :  { %v116_v20 = vsel %vm112_vm1, %v211_v14, %v114_v18  ;;  %v121_v21 = vadd.f32 %v115_v19, %v71_v15  ;;  %v123_v22 = vmul.f32 %v115_v19, %v71_v15  ;;  %v98_v50 = vmul.f32 0.6931472, %v215_v35 }
  0x27   :  { %v122_v23 = vadd.f32 %v116_v20, %v72_v17  ;;  %v124_v24 = vmul.f32 %v116_v20, %v72_v17  ;;  %v95_v60 = vsel %vm337_vm2, %v92_v47, %v89_v46 }
  0x28   :  { %v125_v25 = vmul.f32 2.0, %v123_v22  ;;  %v104_v62 = vsel %vm341_vm3, %v101_v51, %v98_v50  ;;  %v105_v1 = vadd.f32 %v95_v60, %v85_v55 }
  0x29   :  { %v126_v26 = vmul.f32 2.0, %v124_v24  ;;  %v106_v5 = vadd.f32 %v104_v62, %v86_v59 }
  0x2a   :  { %v127_v27 = vsub.f32 %v121_v21, %v125_v25  ;;  %v157_v12 = vmul.f32 %v119_v2, %v105_v1 }
  0x2b   :  { %v128_v28 = vsub.f32 %v122_v23, %v126_v26  ;;  %v158_v15 = vmul.f32 %v120_v3, %v106_v5 }
  0x2c   :  { %v129_v29 = vmax.f32 %v127_v27, 0.0  ;;  %v161_v27 = vld [vmem:[#allocation2] sm:$0x1] }
  0x2d   :  { %v130_v30 = vmax.f32 %v128_v28, 0.0 }
  0x2e   :  { %216 = vrsqrt.f32 %v129_v29  ;;  %vm138_vm4 = vcmp.eq.f32.partialorder %v129_v29, inf  ;;  %v141_v6 = vand.u32 2147483648, %v129_v29  ;;  %vm140_vm5 = vcmp.eq.f32.partialorder %v129_v29, 0.0 }
  0x2f   :  { %218 = vrsqrt.f32 %v130_v30  ;;  %vm150_vm6 = vcmp.eq.f32.partialorder %v130_v30, inf  ;;  %v153_v9 = vand.u32 2147483648, %v130_v30  ;;  %vm152_vm7 = vcmp.eq.f32.partialorder %v130_v30, 0.0 }
  0x34   :  { %v217_v38 = vpop.eup %216 }
  0x35   :  { %v219_v40 = vpop.eup %218  ;;  %v132_v44 = vmul.f32 %v217_v38, %v129_v29 }
  0x36   :  { %v144_v48 = vmul.f32 %v219_v40, %v130_v30 }
  0x37   :  { %v133_v52 = vmul.f32 %v217_v38, %v132_v44 }
  0x38   :  { %v145_v54 = vmul.f32 %v219_v40, %v144_v48 }
  0x39   :  { %v134_v58 = vmul.f32 0.5, %v133_v52 }
  0x3a   :  { %v146_v61 = vmul.f32 0.5, %v145_v54 }
  0x3b   :  { %v135_v63 = vsub.f32 1.5, %v134_v58 }
  0x3c   :  { %v147_v0 = vsub.f32 1.5, %v146_v61 }
  0x3d   :  { %v136_v4 = vmul.f32 %v217_v38, %v135_v63 }
  0x3e   :  { %v148_v7 = vmul.f32 %v219_v40, %v147_v0 }
  0x3f   :  { %v137_v8 = vmul.f32 %v136_v4, %v129_v29 }
  0x40   :  { %v149_v10 = vmul.f32 %v148_v7, %v130_v30 }
  0x41   :  { %v139_v11 = vsel %vm138_vm4, %v129_v29, %v137_v8 }
  0x42   :  { %v142_v13 = vsel %vm140_vm5, %v141_v6, %v139_v11  ;;  %v151_v14 = vsel %vm150_vm6, %v130_v30, %v149_v10 }
  0x43   :  { %v154_v16 = vsel %vm152_vm7, %v153_v9, %v151_v14  ;;  %v155_v17 = vmul.f32 %v142_v13, %v129_v29 }
  0x44   :  { %v156_v18 = vmul.f32 %v154_v16, %v130_v30 }
  0x45   :  { %v159_v19 = vmul.f32 %v157_v12, %v155_v17 }
  0x46   :  { %v160_v20 = vmul.f32 %v158_v15, %v156_v18 }
  0x48   :  { %v162_v21 = vadd.f32 %v160_v20, %v159_v19 }
  0x4a   :  { %v163_v22 = vrot.slane %v162_v21, 4 }
  0x4c   :  { %v164_v23 = vadd.f32 %v163_v22, %v162_v21 }
  0x4e   :  { %v165_v24 = vrot.slane %v164_v23, 2 }
  0x50   :  { %v166_v25 = vadd.f32 %v165_v24, %v164_v23 }
  0x52   :  { %v167_v26 = vrot.slane %v166_v25, 1 }
  0x54   :  { %v168_v28 = vadd.f32 %v167_v26, %v166_v25 }
  0x56   :  { %v169_v31 = vadd.f32 %v168_v28, %v161_v27 }
  0x58   :  { %170 = vst [vmem:[#allocation2] sm:$0x1] %v169_v31 }
  0x5f   :  { %v174_v29 = vld [vmem:[#allocation2] sm:$0x1] }
  0x60   :  { %175 = vst [vmem:[#allocation8] sm:$0x1] %v174_v29 }
  0x61   :  { %186 = dma.vmem_to_hbm [thread:$0]  %s182_s1, 16, %s184_s23, [#allocation5]  }
  0x62   :  { %296 = dma.done.wait [#allocation5], 16  }
  0x63   :  { %297 = vsyncadd [#allocation5], 4294967280 }
  0x64   :  { %191 = vsyncpa [#allocation4], 1 }
  0x65   :  { %192 = vsyncpa [#allocation7], 1 }
  0x66   :  { %193 = vsyncpa [#allocation5], 1 }

</bundles_post_ra>
